<compile_context>
chip_gen: v5e
topology: v5e:2x2
jax: 0.10.0
libtpu: 0.0.40
codegen_flags: <defaults>
</compile_context>

<pallas_src>
import math
from functools import partial

import jax
import jax.numpy as jnp
from jax import lax
from jax.experimental import pallas as pl
from jax.experimental.pallas import tpu as pltpu


def _cdiv(a, b):
    return -(-a // b)


def _round_up(a, b):
    return _cdiv(a, b) * b


# ----------------------------- Pallas kernel ------------------------------ #
def _conv1d_mm_kernel(p_ref, w_ref, b_ref, o_ref):
    # p_ref : (K, tl)   im2col patch tile (compute dtype, e.g. bf16); lanes = output frames
    # w_ref : (F, K)    filterbank weights (compute dtype), grid-resident
    # b_ref : (F, 1)    bias, float32, grid-resident
    # o_ref : (F, tl)   output tile, float32 (lane-dense -> unmasked stores)
    acc = jnp.dot(w_ref[...], p_ref[...], preferred_element_type=jnp.float32)  # (F, tl)
    o_ref[...] = (acc + b_ref[...]).astype(o_ref.dtype)


def _choose_lane_tile(L_out, batch, n_filters, kernel_size,
                      max_tile=4096, overhead_cols=1024,
                      vmem_budget_bytes=24 << 20):
    """Pick the lane (output-frame) tile size.

    - Multiples of 128 -> lane-dense unmasked stores; for L_out <= 128 the only
      legal block is the full extent.
    - Bigger tiles amortize the ~0.35 us per-grid-step overhead; `overhead_cols`
      trades that against edge-padding waste (K<=~64 contraction keeps the MXU
      far from the bottleneck, so HBM/overhead is what we balance).
    - The cap is VMEM-aware: double-buffered patches (bf16) + output (f32)
      must fit `vmem_budget_bytes`, which stays under the 32 MiB scoped limit
      we request on v5e/v6e/v7x.
    - Keep >= 2 grid blocks total so both v7x TensorCores are fed.
    """
    if L_out <= 128:
        return L_out
    # Per-lane-column VMEM bytes, double buffered: patches (K x tl, 2B) and
    # output (F x tl, 4B).  Weight/bias are tiny and grid-resident.
    per_col = kernel_size * 2 * 2 + n_filters * 4 * 2
    fixed = n_filters * kernel_size * 2 * 2 + n_filters * 4 * 2
    vmem_cap = max(128, ((vmem_budget_bytes - fixed) // per_col) // 128 * 128)
    cap = max(128, min(max_tile, (L_out // 128) * 128, vmem_cap))

    best, best_score = 128, None
    for c in range(128, cap + 1, 128):
        score = _cdiv(L_out, c) * (c + overhead_cols)
        if best_score is None or score < best_score or (score == best_score and c > best):
            best, best_score = c, score
    # Keep at least 2 grid blocks (megacore) when possible.
    while batch * _cdiv(L_out, best) < 2 and best > 128:
        best = _round_up(best // 2, 128)
    return best


def _pallas_conv1d_1ch(patches, weight, bias, tl):
    """patches: (B, K, L_out), weight: (F, K), bias: (F, 1) f32 -> (B, F, L_out) f32."""
    B, K, L_out = patches.shape
    F = weight.shape[0]
    n_l = _cdiv(L_out, tl)

    flops = 2 * B * F * K * L_out
    bytes_accessed = (
        patches.size * patches.dtype.itemsize
        + weight.size * weight.dtype.itemsize
        + bias.size * bias.dtype.itemsize
        + B * F * L_out * 4
    )

    return pl.pallas_call(
        _conv1d_mm_kernel,
        out_shape=jax.ShapeDtypeStruct((B, F, L_out), jnp.float32),
        grid=(B, n_l),
        in_specs=[
            pl.BlockSpec((None, K, tl), lambda b, j: (b, 0, j)),  # patch tile
            pl.BlockSpec((F, K), lambda b, j: (0, 0)),            # weights (resident)
            pl.BlockSpec((F, 1), lambda b, j: (0, 0)),            # bias (resident)
        ],
        out_specs=pl.BlockSpec((None, F, tl), lambda b, j: (b, 0, j)),
        compiler_params=pltpu.CompilerParams(
            dimension_semantics=("parallel", "parallel"),
            vmem_limit_bytes=32 << 20,
        ),
        cost_estimate=pl.CostEstimate(
            flops=flops, transcendentals=0, bytes_accessed=bytes_accessed
        ),
    )(patches, weight, bias)


# --------------------------- functional forward ---------------------------- #
@partial(jax.jit, static_argnames=("kernel_size", "stride", "padding", "compute_dtype"))
def _encoder_forward(waveform, weight, bias, *, kernel_size, stride, padding,
                     compute_dtype):
    """waveform: (B, 1, T) f32, weight: (F, 1, K) f32, bias: (F,) f32 -> (B, F, L_out) f32."""
    B, C, T = waveform.shape
    assert C == 1, "Encoder conv has a single input channel"
    K, S, P = kernel_size, stride, padding
    F = weight.shape[0]

    x = waveform[:, 0, :].astype(jnp.float32)  # (B, T)
    if P > 0:
        x = jnp.pad(x, ((0, 0), (P, P)))
    T_pad = T + 2 * P
    L_out = (T_pad - K) // S + 1
    assert L_out >= 1, "input shorter than kernel"

    # Transposed im2col via K strided slices (no gather, no post-transpose);
    # under jit XLA fuses these into a single pass over the waveform:
    #   patches[b, k, j] = x[b, j*S + k]  ->  (B, K, L_out)
    cols = [
        lax.slice(x, (0, k), (B, k + (L_out - 1) * S + 1), (1, S))
        for k in range(K)
    ]
    patches = jnp.stack(cols, axis=1).astype(compute_dtype)
    # TODO(synk): for stride==K//2 the im2col could be built fully in-kernel from
    # the raw waveform (phase reshape / overlapping manual DMA), saving the
    # duplicated input pass; input traffic is ~1/8 of the output so it is minor.

    w = weight[:, 0, :].astype(compute_dtype)  # (F, K)
    b2 = bias[:, None].astype(jnp.float32)     # (F, 1)

    tl = _choose_lane_tile(L_out, batch=B, n_filters=F, kernel_size=K)
    return _pallas_conv1d_1ch(patches, w, b2, tl)  # (B, F, L_out)


# ------------------------------- Encoder ---------------------------------- #
class EncoderPallas:
    """JAX/Pallas port of asteroid_filterbanks Encoder (free filterbank = Conv1d(1, F, K))."""

    def __init__(self, n_filters, kernel_size, stride=None, padding=0,
                 compute_dtype=jnp.bfloat16, key=None):
        self.n_filters = n_filters
        self.kernel_size = kernel_size
        self.stride = stride if stride else kernel_size // 2
        self.padding = padding
        self.compute_dtype = compute_dtype

        if key is None:
            key = jax.random.PRNGKey(0)
        k_w, k_b = jax.random.split(key)

        # nn.init.xavier_normal_ on Conv1d weight (out=F, in=1, K):
        #   fan_in = 1*K, fan_out = F*K, std = sqrt(2 / (fan_in + fan_out))
        fan_in = 1 * kernel_size
        fan_out = n_filters * kernel_size
        std = math.sqrt(2.0 / (fan_in + fan_out))
        self.weight = std * jax.random.normal(
            k_w, (n_filters, 1, kernel_size), dtype=jnp.float32
        )

        # Conv1d default bias init: U(-1/sqrt(fan_in), 1/sqrt(fan_in))
        bound = 1.0 / math.sqrt(fan_in)
        self.bias = jax.random.uniform(
            k_b, (n_filters,), minval=-bound, maxval=bound, dtype=jnp.float32
        )

    def __call__(self, waveform):
        """waveform: (B, 1, T) float32  ->  (B, n_filters, L_out) float32."""
        return _encoder_forward(
            waveform, self.weight, self.bias,
            kernel_size=self.kernel_size, stride=self.stride,
            padding=self.padding, compute_dtype=self.compute_dtype,
        )


# --------------------------------- main ------------------------------------ #
if __name__ == "__main__":
    key = jax.random.PRNGKey(0)
    k_in, k_param = jax.random.split(key)

    # Small shapes consistent with Encoder's forward: waveform (B, 1, T)
    B, T = 2, 256
    n_filters, kernel_size, padding = 64, 16, 0  # stride defaults to K // 2 = 8
    waveform = jax.random.normal(k_in, (B, 1, T), dtype=jnp.float32)

    enc = EncoderPallas(n_filters, kernel_size, stride=None, padding=padding, key=k_param)
    spec = jax.block_until_ready(enc(waveform))

    # Reference check against XLA's conv (same semantics as nn.Conv1d).
    ref = lax.conv_general_dilated(
        waveform, enc.weight,
        window_strides=(enc.stride,),
        padding=[(padding, padding)],
        dimension_numbers=("NCH", "OIH", "NCH"),
    ) + enc.bias[None, :, None]

    assert spec.shape == ref.shape, (spec.shape, ref.shape)
    # bf16 inputs with f32 accumulation -> tolerance loosened vs pure f32.
    err = float(jnp.max(jnp.abs(spec - ref)))
    assert jnp.allclose(spec, ref, atol=2e-2, rtol=2e-2), err

    print("KERNEL_OK")
</pallas_src>

<mosaic_0001>
module attributes {stable_mosaic.version = 11 : i64} {
  func.func @_conv1d_mm_kernel(%arg0: i32, %arg1: i32, %arg2: memref<1x16x31xbf16, #tpu.memory_space<vmem>>, %arg3: memref<64x16xbf16, #tpu.memory_space<vmem>>, %arg4: memref<64x1xf32, #tpu.memory_space<vmem>>, %arg5: memref<1x64x31xf32, #tpu.memory_space<vmem>>) attributes {dimension_semantics = [#tpu.dimension_semantics<parallel>, #tpu.dimension_semantics<parallel>], iteration_bounds = array<i64: 2, 1>, scalar_prefetch = 0 : i64, scratch_operands = 0 : i64, tpu.core_type = #tpu.core_type<tc>, window_params = [{transform_indices = @transform_0, window_bounds = array<i64: 1, 16, 31>}, {pipeline_mode = #tpu.pipeline_mode<synchronous>, transform_indices = @transform_1, window_bounds = array<i64: 64, 16>}, {pipeline_mode = #tpu.pipeline_mode<synchronous>, transform_indices = @transform_2, window_bounds = array<i64: 64, 1>}, {transform_indices = @transform_3, window_bounds = array<i64: 1, 64, 31>}]} {
    %c0 = arith.constant 0 : index
    %c0_0 = arith.constant 0 : index
    %0 = vector.load %arg3[%c0, %c0_0] : memref<64x16xbf16, #tpu.memory_space<vmem>>, vector<64x16xbf16>
    %c0_1 = arith.constant 0 : index
    %c0_2 = arith.constant 0 : index
    %c0_3 = arith.constant 0 : index
    %1 = vector.load %arg2[%c0_1, %c0_2, %c0_3] : memref<1x16x31xbf16, #tpu.memory_space<vmem>>, vector<1x16x31xbf16>
    %2 = vector.shape_cast %1 : vector<1x16x31xbf16> to vector<16x31xbf16>
    %cst = arith.constant dense<0.000000e+00> : vector<64x31xf32>
    %3 = tpu.matmul %0, %2, %cst {dimension_numbers = #tpu.dot_dimension_numbers<[1], [0], [0], [1], [0, 0, 1, 1], [], []>} : vector<64x16xbf16>, vector<16x31xbf16>, vector<64x31xf32> -> vector<64x31xf32>
    %c0_4 = arith.constant 0 : index
    %c0_5 = arith.constant 0 : index
    %4 = vector.load %arg4[%c0_4, %c0_5] : memref<64x1xf32, #tpu.memory_space<vmem>>, vector<64x1xf32>
    %5 = vector.broadcast %4 : vector<64x1xf32> to vector<64x31xf32>
    %6 = arith.addf %3, %5 : vector<64x31xf32>
    %c0_6 = arith.constant 0 : index
    %c0_7 = arith.constant 0 : index
    %c0_8 = arith.constant 0 : index
    %7 = vector.load %arg5[%c0_6, %c0_7, %c0_8] : memref<1x64x31xf32, #tpu.memory_space<vmem>>, vector<1x64x31xf32>
    %8 = vector.shape_cast %7 : vector<1x64x31xf32> to vector<64x31xf32>
    %9 = vector.shape_cast %6 : vector<64x31xf32> to vector<1x64x31xf32>
    tpu.vector_store %arg5[%c0_6, %c0_7, %c0_8], %9 {strides = array<i32>} : memref<1x64x31xf32, #tpu.memory_space<vmem>>, vector<1x64x31xf32>,
    return
  }
  func.func @transform_0(%arg0: i32, %arg1: i32) -> (i32, i32, i32) {
    %c0_i32 = arith.constant 0 : i32
    %c0_i32_0 = arith.constant 0 : i32
    return %arg0, %c0_i32, %arg1 : i32, i32, i32
  }
  func.func @transform_1(%arg0: i32, %arg1: i32) -> (i32, i32) {
    %c0_i32 = arith.constant 0 : i32
    %c0_i32_0 = arith.constant 0 : i32
    %c0_i32_1 = arith.constant 0 : i32
    return %c0_i32, %c0_i32_0 : i32, i32
  }
  func.func @transform_2(%arg0: i32, %arg1: i32) -> (i32, i32) {
    %c0_i32 = arith.constant 0 : i32
    %c0_i32_0 = arith.constant 0 : i32
    %c0_i32_1 = arith.constant 0 : i32
    return %c0_i32, %c0_i32_0 : i32, i32
  }
  func.func @transform_3(%arg0: i32, %arg1: i32) -> (i32, i32, i32) {
    %c0_i32 = arith.constant 0 : i32
    %c0_i32_0 = arith.constant 0 : i32
    return %arg0, %c0_i32, %arg1 : i32, i32, i32
  }
}

</mosaic_0001>

<bundles_post_ra>
// kernel: _encoder_forward.1
= control target key start
LH: loop header
LB: loop body
LE: loop exit
PB: predicated region body
PF: predicated region fallthrough
CT: control target
= control target key end

     0   :  { %s539_s12 = smov 0   ;;  %s541_s13 = smov 0   ;;  %s620_s0 = inlined_call_operand.vmem [shape: bf16[2,16,31], index: 0, kind: input, shape index: {}]   ;;  %s621_s1 = inlined_call_operand.vmem [shape: bf16[64,16], index: 1, kind: input, shape index: {}]   ;;  %s622_s2 = inlined_call_operand.vmem [shape: f32[64,1], index: 2, kind: input, shape index: {}]   ;;  %s623_s3 = inlined_call_operand.vmem [shape: f32[2,64,31], index: 3, kind: output, shape index: {}]  }
   0x1   :  { %s543_s14 = smov 0  }
   0x2 LB: > { %s25_s15 = sadd.s32 1, %s512_s13  ;;  %p425_p0 = scmp.ge.s32.totalorder %s516_s14, 1  ;;  %s516_s14 = sphi %s543_s14, %s13_s14   ;;  %s512_s13 = sphi %s541_s13, %s625_s13   ;;  %s508_s12 = sphi %s539_s12, %s624_s12  }
   0x3   : > { %p27_p1 = scmp.ge.s32.totalorder %s25_s15, 2  ;;  %p156_p2 = scmp.lt.s32.totalorder %s516_s14, 3 }
   0x5   : > { %s627_s15 = smov (%p27_p1, %s25_s15), 0  ;;  %p157_p3 = pnand %p425_p0, %p156_p2 }
   0x6   : > { %p186_p4 = scmp.lt.s32.totalorder (!%p157_p3), %s508_s12, 1 }
   0x7   : > { %160 = sbr.rel (%p157_p3) target bundleno = 164 (0xa4), region = 32 }
   0xc   : > { %v215_v0 = vld [vmem:[%s622_s2 + $0x10] sm:$0xff]  ;;  %v213_v1 = vld [vmem:[%s622_s2] sm:$0xff]  ;;  %v518_v2 = vmov 0   ;;  %s629_s12 = smov (!%p186_p4, %s508_s12), 1  ;;  %v459_v6 = vld [vmem:[%s621_s1 + $0x8] sm:$0xff]  ;;  %vm287_vm0 = vcmask 130048  }
   0xd   : > { %492 = vset.pattern.permute.xlu1 %v518_v2  ;;  %491 = vset.pattern.permute.xlu0 %v518_v2  ;;  %v217_v3 = vld [vmem:[%s622_s2 + $0x20] sm:$0xff]  ;;  %s456_s22 = sshll.u32 %s629_s12, 3  ;;  %v216_v7 = vld [vmem:[%s622_s2 + $0x18] sm:$0xff]  ;;  %v214_v8 = vld [vmem:[%s622_s2 + $0x8] sm:$0xff]  ;;  %s457_s21 = sshll.u32 %s629_s12, 6  ;;  %vm329_vm1 = vcmask 252928  }
   0xe   : > { %233 = vperm.xlu1 %492, %v215_v0   ;;  %223 = vperm.xlu0 %491, %v213_v1   ;;  %s193_s25 = scalar_lea.vmem %s620_s0, %s456_s22  ;;  %v458_v5 = vld [vmem:[%s621_s1] sm:$0xff]  ;;  %v460_v9 = vld [vmem:[%s621_s1 + $0x10] sm:$0xff]  ;;  %v461_v10 = vld [vmem:[%s621_s1 + $0x18] sm:$0xff]  ;;  %s201_s24 = scalar_lea.vmem %s623_s3, %s457_s21 }
   0xf   : > { %493 = vset.pattern.permute.xlu2 %v518_v2  ;;  %v462_v4 = vld [vmem:[%s193_s25] sm:$0xff]  ;;  %v218_v11 = vld [vmem:[%s622_s2 + $0x28] sm:$0xff]  ;;  %v220_v12 = vld [vmem:[%s622_s2 + $0x38] sm:$0xff] }
  0x10   : > { %243 = vperm.xlu2 %493, %v217_v3   ;;  %307 = vmatpush.bf16.msra.mxu0 %v462_v4  ;;  %v219_v13 = vld [vmem:[%s622_s2 + $0x30] sm:$0xff] }
  0x11   : > { %463 = vmatpush.bf16.msra.mxu1 %v462_v4  ;;  %464 = vmatpush.bf16.msra.mxu2 %v462_v4 }
  0x12   : > { %465 = vmatpush.bf16.msra.mxu3 %v462_v4 }
  0x13   : > { %450 = vmatmul.msk.bf16.vlgmr.msra.gmra.mxu0 %vm287_vm0, %v458_v5 }
  0x14   : > { %451 = vmatmul.msk.bf16.vlgmr.msra.gmra.mxu1 %vm287_vm0, %v459_v6  ;;  %452 = vmatmul.msk.bf16.vlgmr.msra.gmra.mxu2 %vm287_vm0, %v460_v9 }
  0x15   : > { %453 = vmatmul.msk.bf16.vlgmr.msra.gmra.mxu3 %vm287_vm0, %v461_v10 }
  0x16   : > { %238 = vperm.xlu1 %492, %v216_v7   ;;  %228 = vperm.xlu0 %491, %v214_v8  }
  0x18   : > { %248 = vperm.xlu2 %493, %v218_v11  }
  0x1e   : > { %258 = vperm.xlu1 %492, %v220_v12   ;;  %253 = vperm.xlu0 %491, %v219_v13  }
  0x6a   : > { %v244_v22 = vpop.permute.xlu2 %243 }
  0x72   : > { %v249_v33 = vpop.permute.xlu2 %248 }
  0x80   : > { %v224_v14 = vpop.permute.xlu0 %223  ;;  %v234_v15 = vpop.permute.xlu1 %233 }
  0x88   : > { %v229_v16 = vpop.permute.xlu0 %228  ;;  %v239_v21 = vpop.permute.xlu1 %238 }
  0x90   : > { %v309_v17 = vpop.f32.mrf.mxu0  ;;  %v254_v23 = vpop.permute.xlu0 %253 }
  0x91   : > { %v314_v18 = vpop.f32.mrf.mxu1  ;;  %v310_v19 = vadd.f32 %v309_v17, %v224_v14  ;;  %v259_v32 = vpop.permute.xlu1 %258 }
  0x92   : > { %v315_v20 = vadd.f32 %v314_v18, %v234_v15 }
  0x93   : > { %330 = vst.msk [vmem:[%s201_s24] sm:$0xff] %vm329_vm1, %v310_v19 }
  0x94   : > { %332 = vst.msk [vmem:[%s201_s24 + $0x10] sm:$0xff] %vm329_vm1, %v315_v20 }
  0x97   : > { %v319_v24 = vpop.f32.mrf.mxu2 }
  0x98   : > { %v324_v25 = vpop.f32.mrf.mxu3  ;;  %v320_v26 = vadd.f32 %v319_v24, %v244_v22  ;;  %v311_v28 = vpop.f32.mrf.mxu0 }
  0x99   : > { %v325_v27 = vadd.f32 %v324_v25, %v254_v23  ;;  %v316_v29 = vpop.f32.mrf.mxu1  ;;  %v312_v30 = vadd.f32 %v311_v28, %v229_v16 }
  0x9a   : > { %v317_v31 = vadd.f32 %v316_v29, %v239_v21  ;;  %334 = vst.msk [vmem:[%s201_s24 + $0x20] sm:$0xff] %vm329_vm1, %v320_v26 }
  0x9b   : > { %336 = vst.msk [vmem:[%s201_s24 + $0x30] sm:$0xff] %vm329_vm1, %v325_v27 }
  0x9c   : > { %331 = vst.msk [vmem:[%s201_s24 + $0x8] sm:$0xff] %vm329_vm1, %v312_v30 }
  0x9d   : > { %333 = vst.msk [vmem:[%s201_s24 + $0x18] sm:$0xff] %vm329_vm1, %v317_v31 }
  0x9f   : > { %v321_v34 = vpop.f32.mrf.mxu2 }
  0xa0   : > { %v326_v35 = vpop.f32.mrf.mxu3  ;;  %v322_v36 = vadd.f32 %v321_v34, %v249_v33 }
  0xa1   : > { %v327_v37 = vadd.f32 %v326_v35, %v259_v32 }
  0xa2   : > { %335 = vst.msk [vmem:[%s201_s24 + $0x28] sm:$0xff] %vm329_vm1, %v322_v36 }
  0xa3   : > { %337 = vst.msk [vmem:[%s201_s24 + $0x38] sm:$0xff] %vm329_vm1, %v327_v37 }
  0xa4 PF: > { %s13_s14 = sadd.s32 1, %s516_s14   ;;  %s624_s12 = smov %s512_s13 }
  0xa5   : > { %p10_p5 = scmp.ge.s32.totalorder %s13_s14, 4   ;;  %s625_s13 = smov %s627_s15 }
  0xa7   :  { %12 = sbr.rel (!%p10_p5) target bundleno = 2 (0x2), region = 62 }

</bundles_post_ra>
